<compile_context>
chip_gen: v7x
topology: tpu7x:2x2x1
jax: 0.10.0
libtpu: 0.0.40
codegen_flags: <defaults>
</compile_context>

<pallas_src>
import jax
import jax.numpy as jnp
from jax.experimental import pallas as pl
from jax.experimental.pallas import tpu as pltpu

LANE = 128
SUBLANE = 8
_MIB = 1024 * 1024


def _round_up(x, m):
    return ((x + m - 1) // m) * m


# ----------------------------------------------------------------------------
# Kernels
# ----------------------------------------------------------------------------
def _logreg_resident_kernel(x_ref, w_ref, b_ref, o_ref):
    # x_ref: (TM, H)   activation tile (pipelined over the batch grid)
    # w_ref: (H, O)    pre-transposed weight, VMEM-resident (natural K x N)
    # b_ref: (1, O)    bias row, VMEM-resident
    # o_ref: (TM, O)   output tile
    acc = jnp.dot(x_ref[...], w_ref[...], preferred_element_type=jnp.float32)
    o_ref[...] = (acc + b_ref[...].astype(jnp.float32)).astype(o_ref.dtype)


def _logreg_ktiled_kernel(x_ref, w_ref, b_ref, o_ref, acc_ref):
    # Streaming-K path for weights too large to stay VMEM-resident.
    # x_ref: (TM, TK), w_ref: (TK, O), acc_ref: (TM, O) f32 scratch.
    k = pl.program_id(1)

    @pl.when(k == 0)
    def _():
        acc_ref[...] = jnp.zeros_like(acc_ref)

    acc_ref[...] += jnp.dot(x_ref[...], w_ref[...],
                            preferred_element_type=jnp.float32)

    @pl.when(k == pl.num_programs(1) - 1)
    def _():
        o_ref[...] = (acc_ref[...] + b_ref[...].astype(jnp.float32)).astype(o_ref.dtype)


# ----------------------------------------------------------------------------
# Parameter prep (done once, outside the forward path)
# ----------------------------------------------------------------------------
def prepare_params(weight, bias, dtype=None):
    """weight: (out_dim, hid_dim) PyTorch layout; bias: (out_dim,).

    Returns:
      w_kn  : (hid_dim, o_pad) pre-transposed (K, N) weight
      b_row : (1, o_pad) bias row
    Output-dim padding to a 128-lane multiple is applied only when
    out_dim >= 128 (lane-dense stores win there); tiny out_dim stays unpadded
    to avoid inflating HBM writeback and the post-kernel slice.
    """
    o, h = weight.shape
    if dtype is None:
        dtype = weight.dtype
    o_pad = _round_up(o, LANE) if o >= LANE else o
    w_kn = jnp.zeros((h, o_pad), dtype=dtype).at[:, :o].set(weight.T.astype(dtype))
    b_row = jnp.zeros((1, o_pad), dtype=dtype).at[:, :o].set(bias.astype(dtype))
    return w_kn, b_row


# ----------------------------------------------------------------------------
# Forward
# ----------------------------------------------------------------------------
def logreg_forward(x, w_kn, b_row, out_dim):
    """y = x @ W.T + b, with W/b pre-processed by prepare_params."""
    n, h = x.shape
    h_w, o_pad = w_kn.shape
    assert h == h_w, "hid_dim mismatch between x and prepared weight"

    x_isz = jnp.dtype(x.dtype).itemsize
    w_isz = jnp.dtype(w_kn.dtype).itemsize

    # Batch tile: large fixed tile with a cdiv grid (no x padding, ragged last
    # block is masked by Pallas). Cap 512 is safe on all chips; could be
    # raised to 1024+ on v6e (128 MiB VMEM).
    tm = min(512, _round_up(n, SUBLANE))
    # v7x has 2 TensorCores: keep >=2 steps on the parallel axis when possible.
    while pl.cdiv(n, tm) < 2 and tm > SUBLANE:
        tm = _round_up(max(tm // 2, SUBLANE), SUBLANE)
    grid_m = pl.cdiv(n, tm)

    # VMEM footprint of the resident-weight path (2x = double buffering).
    w_bytes = h * o_pad * w_isz
    resident_need = (2 * w_bytes
                     + 2 * tm * h * x_isz
                     + 2 * tm * o_pad * x_isz
                     + 2 * o_pad * w_isz)
    budget = 48 * _MIB  # conservative: v7x has 64 MiB physical VMEM per TC

    tk = None
    if resident_need > budget:
        for cand in (2048, 1024, 512, 256, 128):
            if h % cand == 0:
                tk = cand
                break
        # TODO(synk): if hid_dim has no 128-multiple divisor, pad H (weight at
        # prepare time, x per call) before K-tiling; fall back to resident here.

    if tk is None:
        # ---- resident-weight path -------------------------------------------
        vmem_limit = min(max(resident_need * 5 // 4 + _MIB, 16 * _MIB), 64 * _MIB)
        out = pl.pallas_call(
            _logreg_resident_kernel,
            out_shape=jax.ShapeDtypeStruct((n, o_pad), x.dtype),
            grid=(grid_m,),
            in_specs=[
                pl.BlockSpec((tm, h), lambda i: (i, 0)),       # x tile, pipelined
                pl.BlockSpec((h, o_pad), lambda i: (0, 0)),    # weight, VMEM-resident
                pl.BlockSpec((1, o_pad), lambda i: (0, 0)),    # bias row
            ],
            out_specs=pl.BlockSpec((tm, o_pad), lambda i: (i, 0)),
            compiler_params=pltpu.CompilerParams(
                dimension_semantics=("parallel",),
                vmem_limit_bytes=int(vmem_limit),
            ),
        )(x, w_kn, b_row)
    else:
        # ---- streaming-K path (weight too big to stay resident) -------------
        grid_k = h // tk
        ktiled_need = (2 * tm * tk * x_isz
                       + 2 * tk * o_pad * w_isz
                       + 2 * tm * o_pad * x_isz
                       + tm * o_pad * 4          # f32 accumulator scratch
                       + 2 * o_pad * w_isz)
        vmem_limit = min(max(ktiled_need * 5 // 4 + _MIB, 16 * _MIB), 64 * _MIB)
        out = pl.pallas_call(
            _logreg_ktiled_kernel,
            out_shape=jax.ShapeDtypeStruct((n, o_pad), x.dtype),
            grid=(grid_m, grid_k),
            in_specs=[
                pl.BlockSpec((tm, tk), lambda i, k: (i, k)),
                pl.BlockSpec((tk, o_pad), lambda i, k: (k, 0)),
                pl.BlockSpec((1, o_pad), lambda i, k: (0, 0)),
            ],
            out_specs=pl.BlockSpec((tm, o_pad), lambda i, k: (i, 0)),
            scratch_shapes=[pltpu.VMEM((tm, o_pad), jnp.float32)],
            compiler_params=pltpu.CompilerParams(
                dimension_semantics=("parallel", "arbitrary"),
                vmem_limit_bytes=int(vmem_limit),
            ),
        )(x, w_kn, b_row)

    if o_pad != out_dim:
        # Only hit when out_dim >= 128 and not a multiple of 128; downstream
        # consumers that tolerate padded columns can skip this copy.
        out = out[:, :out_dim]
    return out


def xavier_uniform(key, out_dim, in_dim, dtype=jnp.float32):
    # matches torch.nn.init.xavier_uniform_ (gain=1): U(-a, a), a=sqrt(6/(fan_in+fan_out))
    a = (6.0 / (in_dim + out_dim)) ** 0.5
    return jax.random.uniform(key, (out_dim, in_dim), dtype=dtype, minval=-a, maxval=a)


if __name__ == "__main__":
    hid_dim, out_dim, batch = 32, 8, 4

    key = jax.random.PRNGKey(0)
    k_x, k_w = jax.random.split(key)

    x = jax.random.normal(k_x, (batch, hid_dim), dtype=jnp.float32)
    weight = xavier_uniform(k_w, out_dim, hid_dim)   # (out_dim, hid_dim), PyTorch layout
    bias = jnp.zeros((out_dim,), dtype=jnp.float32)  # bias.data.fill_(0.0)

    # One-time parameter prep (transpose / optional lane padding).
    w_kn, b_row = prepare_params(weight, bias)

    out = logreg_forward(x, w_kn, b_row, out_dim)
    jax.block_until_ready(out)

    # sanity check against plain-JAX reference
    ref = x @ weight.T + bias
    assert out.shape == (batch, out_dim)
    assert jnp.allclose(out, ref, atol=1e-5, rtol=1e-5)

    print("KERNEL_OK")
</pallas_src>

<mosaic_0001>
module attributes {stable_mosaic.version = 11 : i64} {
  func.func @_logreg_resident_kernel(%arg0: i32, %arg1: memref<8x32xf32, #tpu.memory_space<vmem>>, %arg2: memref<32x8xf32, #tpu.memory_space<vmem>>, %arg3: memref<1x8xf32, #tpu.memory_space<vmem>>, %arg4: memref<8x8xf32, #tpu.memory_space<vmem>>) attributes {dimension_semantics = [#tpu.dimension_semantics<parallel>], iteration_bounds = array<i64: 1>, scalar_prefetch = 0 : i64, scratch_operands = 0 : i64, tpu.core_type = #tpu.core_type<tc>, window_params = [{transform_indices = @transform_0, window_bounds = array<i64: 8, 32>}, {pipeline_mode = #tpu.pipeline_mode<synchronous>, transform_indices = @transform_1, window_bounds = array<i64: 32, 8>}, {pipeline_mode = #tpu.pipeline_mode<synchronous>, transform_indices = @transform_2, window_bounds = array<i64: 1, 8>}, {transform_indices = @transform_3, window_bounds = array<i64: 8, 8>}]} {
    %c0 = arith.constant 0 : index
    %c0_0 = arith.constant 0 : index
    %0 = vector.load %arg1[%c0, %c0_0] : memref<8x32xf32, #tpu.memory_space<vmem>>, vector<8x32xf32>
    %c0_1 = arith.constant 0 : index
    %c0_2 = arith.constant 0 : index
    %1 = vector.load %arg2[%c0_1, %c0_2] : memref<32x8xf32, #tpu.memory_space<vmem>>, vector<32x8xf32>
    %cst = arith.constant dense<0.000000e+00> : vector<8x8xf32>
    %2 = tpu.matmul %0, %1, %cst {dimension_numbers = #tpu.dot_dimension_numbers<[1], [0], [0], [1], [0, 0, 1, 1], [], []>} : vector<8x32xf32>, vector<32x8xf32>, vector<8x8xf32> -> vector<8x8xf32>
    %c0_3 = arith.constant 0 : index
    %c0_4 = arith.constant 0 : index
    %3 = vector.load %arg3[%c0_3, %c0_4] : memref<1x8xf32, #tpu.memory_space<vmem>>, vector<1x8xf32>
    %4 = vector.broadcast %3 : vector<1x8xf32> to vector<8x8xf32>
    %5 = arith.addf %2, %4 : vector<8x8xf32>
    %c0_5 = arith.constant 0 : index
    %c0_6 = arith.constant 0 : index
    %6 = vector.load %arg4[%c0_5, %c0_6] : memref<8x8xf32, #tpu.memory_space<vmem>>, vector<8x8xf32>
    tpu.vector_store %arg4[%c0_5, %c0_6], %5 {strides = array<i32>} : memref<8x8xf32, #tpu.memory_space<vmem>>, vector<8x8xf32>,
    return
  }
  func.func @transform_0(%arg0: i32) -> (i32, i32) {
    %c0_i32 = arith.constant 0 : i32
    %c0_i32_0 = arith.constant 0 : i32
    return %arg0, %c0_i32 : i32, i32
  }
  func.func @transform_1(%arg0: i32) -> (i32, i32) {
    %c0_i32 = arith.constant 0 : i32
    %c0_i32_0 = arith.constant 0 : i32
    %c0_i32_1 = arith.constant 0 : i32
    return %c0_i32, %c0_i32_0 : i32, i32
  }
  func.func @transform_2(%arg0: i32) -> (i32, i32) {
    %c0_i32 = arith.constant 0 : i32
    %c0_i32_0 = arith.constant 0 : i32
    %c0_i32_1 = arith.constant 0 : i32
    return %c0_i32, %c0_i32_0 : i32, i32
  }
  func.func @transform_3(%arg0: i32) -> (i32, i32) {
    %c0_i32 = arith.constant 0 : i32
    %c0_i32_0 = arith.constant 0 : i32
    return %arg0, %c0_i32 : i32, i32
  }
}

</mosaic_0001>

<bundles_post_ra>
// kernel: tpu_custom_call.1
= control target key start
LH: loop header
LB: loop body
LE: loop exit
PB: predicated region body
PF: predicated region fallthrough
CT: control target
= control target key end

     0   :  { %8 = vsyncpa [#allocation3], 0  ;;  %v173_v2 = vmov 0.0|0.0   ;;  %vm174_vm0 = vmmov 0   ;;  %v175_v6 = vmov 0.0   ;;  %vm27_vm1 = vcmask 261120   ;;  %s229_s0 = inlined_call_operand.vmem [shape: f32[4,32], index: 0, kind: input, shape index: {}]   ;;  %s230_s1 = inlined_call_operand.vmem [shape: f32[32,8], index: 1, kind: input, shape index: {}]   ;;  %s231_s2 = inlined_call_operand.vmem [shape: f32[1,8], index: 2, kind: input, shape index: {}]   ;;  %s232_s3 = inlined_call_operand.hbm [shape: f32[4,8], index: 3, kind: output, shape index: {}]  }
   0x1   :  { %v16_v0 = vld [vmem:[%s230_s1] sm:$0xff]  ;;  %v17_v1 = vld [vmem:[%s230_s1 + $0x8] sm:$0xff]  ;;  %137 = vmatprep.subr.bf16.mxu0 %v173_v2  ;;  %v18_v4 = vld [vmem:[%s230_s1 + $0x10] sm:$0xff]  ;;  %134 = vmatprep.mubr.msk.f32.mxu0 %vm174_vm0, %v175_v6  ;;  %vm101_vm2 = vcmask 64512  }
   0x2   :  { %v138_v3 = vpack.c.bf16 %v17_v1, %v16_v0  ;;  %v19_v5 = vld [vmem:[%s230_s1 + $0x18] sm:$0xff]  ;;  %v15_v8 = vld [vmem:[%s229_s0] sm:$0xff] }
   0x3   :  { %v141_v7 = vpack.c.bf16 %v19_v5, %v18_v4  ;;  %v119_v9 = vld [vmem:[%s231_s2] ss:$0 sm:$0xff] }
   0x4   :  { %139 = vmatpush3.bf16.msra.mxu0 %v138_v3 }
   0x5   :  { %140 = vmatprep.subr.bf16.mxu0 %v173_v2 }
   0x8   :  { %142 = vmatpush3.bf16.msra.mxu0 %v141_v7 }
   0xb   :  { %135 = vmatmul.mubr.msk.f32.vlgmr.msra.gmra.mrb[0].mxu0 %vm27_vm1, %v15_v8 }
  0xde   :  { %v97_v10 = vpop.f32.mrb[0].mxu0 }
  0xdf   :  { %v98_v11 = vadd.f32 %v119_v9, %v97_v10  ;;  %v136_v12 = vpop.f32.mrb[1].mxu0 }
  0xe1   :  { %102 = vst.msk [vmem:[#allocation2] sm:$0xff] %vm101_vm2, %v98_v11 }
  0xe2   :  { %107 = vsyncadd [#allocation3], 64  ;;  %s176_s1 = smov [#allocation2]  }
  0xe3   :  { %s108_s24 = sshll.u32 %s176_s1, 4  ;;  %s109_s24 = int_to_ptr.vmem [resolvable:$true] %s108_s24 }
  0xe4   :  { %s149_s25 = scalar_lea.vmem %s109_s24, 64  ;;  %s153_s26 = scalar_lea.vmem %s109_s24, 128 }
  0xe5   :  { %p150_p0 = scmp.ne.s32.totalorder %s109_s24, %s149_s25  ;;  %p154_p1 = scmp.lt.s32.totalorder %s109_s24, %s109_s24 }
  0xe6   :  { %p155_p2 = scmp.lt.s32.totalorder %s153_s26, %s149_s25 }
  0xe8   :  { %p156_p3 = por %p155_p2, %p154_p1 }
  0xea   :  { %p157_p4 = pnand %p156_p3, %p150_p0 }
  0xec   :  { %160 = shalt.err (!%p157_p4)
}
  0xed   :  { %s161_s2 = scalar_lea.hbm %s232_s3, 64 }
  0xee   :  { %p162_p5 = scmp.ne.s32.totalorder %s232_s3, %s161_s2  ;;  %p165_p6 = scmp.lt.u32.totalorder %s161_s2, %s232_s3 }
  0xf0   :  { %p167_p7 = pnand %p165_p6, %p162_p5 }
  0xf2   :  { %170 = shalt.err (!%p167_p7)
}
  0xf3   :  { %s177_s5 = smov 64   ;;  %s178_s6 = smov 4  }
  0xf4   :  { %114 = dma.vmem_to_hbm [thread:$0]  %s109_s24, 64, %s232_s3, [#allocation3], %s177_s5, %s177_s5, %s178_s6  }
  0xf5   :  { %171 = dma.done.wait [#allocation3], 128  }
  0xf6   :  { %172 = vsyncadd [#allocation3], 4294967168 }
  0xf7   :  { %118 = vsyncpa [#allocation3], 1 }

</bundles_post_ra>
